<compile_context>
chip_gen: v7x
topology: tpu7x:2x2x1
jax: 0.10.0
libtpu: 0.0.40
codegen_flags: <defaults>
</compile_context>

<pallas_src>
import math

import jax
import jax.numpy as jnp
from jax.experimental import pallas as pl
from jax.experimental.pallas import tpu as pltpu


_SQRT_2_OVER_PI = math.sqrt(2.0 / math.pi)
_GELU_COEF = 0.044715

_LANES = 128
_ROW_ALIGN = 32              # legal sublane multiple for f32(8)/bf16(16)/int8(32)
_TARGET_STEPS = 8            # pipeline fill + balanced sharding for v7x's 2 TCs
_MIN_TILE_BYTES = 1 << 20    # never shrink tiles below ~1 MiB (step overhead)
_FALLBACK_VMEM_BYTES = 64 << 20   # conservative default (v7x per-core VMEM)


def _vmem_capacity_bytes():
    """Physical per-core VMEM (v5e/v6e: 128 MiB, v7x: 64 MiB), with fallback."""
    try:
        cap = getattr(pltpu.get_tpu_info(), "vmem_capacity_bytes", None)
        if cap:
            return int(cap)
    except Exception:
        pass
    return _FALLBACK_VMEM_BYTES


def _gelu_math(x):
    xf = x.astype(jnp.float32)
    inner = _SQRT_2_OVER_PI * (xf + _GELU_COEF * xf * xf * xf)
    return 0.5 * xf * (1.0 + jnp.tanh(inner))


def _gelu_kernel(x_ref, o_ref):
    # In-kernel f32 upcast: free under the memory roofline (VPU/EUP slack),
    # keeps HBM traffic at the input dtype's width.
    o_ref[...] = _gelu_math(x_ref[...]).astype(o_ref.dtype)


def _round_up(a, b):
    return ((a + b - 1) // b) * b


def _choose_block_rows(rows, itemsize, vmem_cap):
    """Near-equal row blocks: large enough to hide per-step overhead, small
    enough for double-buffered in+out to fit VMEM, with ~4-8 steps once the
    tensor is big enough that splitting is worthwhile."""
    bytes_per_row = _LANES * itemsize
    total_bytes = rows * bytes_per_row
    # Per-generation tile-byte target: VMEM/8 -> 8 MiB on v7x, 16 MiB on v5e/v6e.
    target_rows = max(_ROW_ALIGN, (vmem_cap // 8) // bytes_per_row)
    # Enough steps for pipeline fill + both v7x TensorCores, but never so many
    # that tiles drop below ~1 MiB.
    max_useful_steps = max(1, total_bytes // _MIN_TILE_BYTES)
    min_steps_for_vmem = pl.cdiv(rows, target_rows)
    steps = max(min_steps_for_vmem, min(_TARGET_STEPS, max_useful_steps))
    if steps <= 1:
        return rows  # single full-array block (always a legal block shape)
    # Even split (rounded to a sublane-legal multiple): the last block stays
    # within a few percent of the others -> balanced v7x TC sharding, no
    # "one 4096-row block + tiny ragged block" pathology.
    return _round_up(pl.cdiv(rows, steps), _ROW_ALIGN)


def _gelu_2d(x2d, donate=False):
    rows, lanes = x2d.shape
    itemsize = jnp.dtype(x2d.dtype).itemsize
    vmem_cap = _vmem_capacity_bytes()
    block_rows = _choose_block_rows(rows, itemsize, vmem_cap)
    grid = (pl.cdiv(rows, block_rows),)   # ragged last row-block is masked

    # Scoped VMEM: double-buffered input + output tiles, plus headroom,
    # always below physical VMEM (<= ~48 MiB on v7x, <= ~80 MiB on v5e/v6e).
    working_set = 4 * block_rows * lanes * itemsize
    vmem_limit = max(32 << 20, min(vmem_cap - (4 << 20), working_set + (16 << 20)))

    n_elems = rows * lanes
    cost = pl.CostEstimate(
        flops=10 * n_elems,            # ~muls/adds per element (memory-bound anyway)
        transcendentals=n_elems,       # one tanh per element
        bytes_accessed=2 * n_elems * itemsize,
    )

    kwargs = {}
    if donate:
        # Only pays off when the caller actually donates the input buffer;
        # otherwise XLA inserts a defensive copy (an extra HBM pass).
        kwargs["input_output_aliases"] = {0: 0}

    return pl.pallas_call(
        _gelu_kernel,
        out_shape=jax.ShapeDtypeStruct((rows, lanes), x2d.dtype),
        grid_spec=pltpu.PrefetchScalarGridSpec(
            num_scalar_prefetch=0,
            grid=grid,
            in_specs=[pl.BlockSpec((block_rows, lanes), lambda i: (i, 0))],
            out_specs=pl.BlockSpec((block_rows, lanes), lambda i: (i, 0)),
        ),
        compiler_params=pltpu.CompilerParams(
            dimension_semantics=("parallel",),   # shards the grid across v7x's 2 TCs
            vmem_limit_bytes=int(vmem_limit),
        ),
        cost_estimate=cost,
        **kwargs,
    )(x2d)


def gelu_pallas(x, donate_input=False):
    """Tanh-approximate GELU, elementwise, arbitrary input shape/dtype."""
    orig_shape = x.shape
    flat = x.reshape(-1)
    n = flat.shape[0]
    if n == 0:
        return x

    n_main = (n // _LANES) * _LANES

    if n_main == n:
        # Common case: length is a multiple of 128. The reshape to a
        # lane-dense (rows, 128) slab is a free contiguous reshape — no pad
        # copy in, no slice copy out.
        y = _gelu_2d(flat.reshape(-1, _LANES), donate=donate_input)
        return y.reshape(orig_shape)

    # Rare ragged case: kernel on the 128-aligned prefix + identical math in
    # plain jnp on the (<128-element) tail. The concatenate costs one extra
    # HBM pass, accepted because activation shapes are virtually always
    # 128-aligned in practice.
    parts = []
    if n_main:
        parts.append(_gelu_2d(flat[:n_main].reshape(-1, _LANES)).reshape(-1))
    parts.append(_gelu_math(flat[n_main:]).astype(x.dtype))
    return jnp.concatenate(parts).reshape(orig_shape)


def _gelu_ref(x):
    xf = x.astype(jnp.float32)
    return (0.5 * xf * (1.0 + jnp.tanh(_SQRT_2_OVER_PI * (xf + _GELU_COEF * xf ** 3)))).astype(x.dtype)


if __name__ == "__main__":
    key = jax.random.PRNGKey(0)

    # Primary test: NCHW-style conv activation map (128-aligned fast path,
    # single full-array block).
    x = jax.random.normal(key, (2, 4, 16, 16), dtype=jnp.float32)
    y = gelu_pallas(x)
    jax.block_until_ready(y)
    assert y.shape == x.shape and y.dtype == x.dtype
    assert jnp.allclose(y, _gelu_ref(x), atol=1e-5, rtol=1e-5)

    # Larger aligned input (~2 MiB): exercises the multi-step, evenly-split
    # parallel grid path.
    k1, k2, k3 = jax.random.split(key, 3)
    xl = jax.random.normal(k1, (8, 16, 64, 64), dtype=jnp.float32)
    yl = gelu_pallas(xl)
    jax.block_until_ready(yl)
    assert jnp.allclose(yl, _gelu_ref(xl), atol=1e-5, rtol=1e-5)

    # bf16 input: in-kernel f32 upcast, bf16 HBM traffic.
    xb = jax.random.normal(k2, (4, 8, 16, 16), dtype=jnp.bfloat16)
    yb = gelu_pallas(xb)
    jax.block_until_ready(yb)
    assert yb.dtype == jnp.bfloat16
    assert jnp.allclose(yb.astype(jnp.float32), _gelu_ref(xb).astype(jnp.float32),
                        atol=2e-2, rtol=2e-2)

    # Non-128-aligned input: aligned prefix through the kernel + jnp tail.
    xr = jax.random.normal(k3, (5, 7, 11, 13), dtype=jnp.float32)
    yr = gelu_pallas(xr)
    jax.block_until_ready(yr)
    assert yr.shape == xr.shape
    assert jnp.allclose(yr, _gelu_ref(xr), atol=1e-5, rtol=1e-5)

    print("KERNEL_OK")
</pallas_src>

<mosaic_0001>
module attributes {stable_mosaic.version = 11 : i64} {
  func.func @_gelu_kernel(%arg0: i32, %arg1: memref<16x128xf32, #tpu.memory_space<vmem>>, %arg2: memref<16x128xf32, #tpu.memory_space<vmem>>) attributes {dimension_semantics = [#tpu.dimension_semantics<parallel>], iteration_bounds = array<i64: 1>, scalar_prefetch = 0 : i64, scratch_operands = 0 : i64, tpu.core_type = #tpu.core_type<tc>, window_params = [{transform_indices = @transform_0, window_bounds = array<i64: 16, 128>}, {transform_indices = @transform_1, window_bounds = array<i64: 16, 128>}]} {
    %c0 = arith.constant 0 : index
    %c0_0 = arith.constant 0 : index
    %0 = vector.load %arg1[%c0, %c0_0] : memref<16x128xf32, #tpu.memory_space<vmem>>, vector<16x128xf32>
    %cst = arith.constant 4.471500e-02 : f32
    %1 = vector.broadcast %cst : f32 to vector<16x128xf32>
    %2 = arith.mulf %1, %0 : vector<16x128xf32>
    %3 = arith.mulf %2, %0 : vector<16x128xf32>
    %4 = arith.mulf %3, %0 : vector<16x128xf32>
    %5 = arith.addf %0, %4 : vector<16x128xf32>
    %cst_1 = arith.constant 0.797884583 : f32
    %6 = vector.broadcast %cst_1 : f32 to vector<16x128xf32>
    %7 = arith.mulf %6, %5 : vector<16x128xf32>
    %cst_2 = arith.constant 5.000000e-01 : f32
    %8 = vector.broadcast %cst_2 : f32 to vector<16x128xf32>
    %9 = arith.mulf %8, %0 : vector<16x128xf32>
    %10 = math.tanh %7 : vector<16x128xf32>
    %cst_3 = arith.constant 1.000000e+00 : f32
    %11 = vector.broadcast %cst_3 : f32 to vector<16x128xf32>
    %12 = arith.addf %11, %10 : vector<16x128xf32>
    %13 = arith.mulf %9, %12 : vector<16x128xf32>
    %c0_4 = arith.constant 0 : index
    %c0_5 = arith.constant 0 : index
    %14 = vector.load %arg2[%c0_4, %c0_5] : memref<16x128xf32, #tpu.memory_space<vmem>>, vector<16x128xf32>
    tpu.vector_store %arg2[%c0_4, %c0_5], %13 {strides = array<i32>} : memref<16x128xf32, #tpu.memory_space<vmem>>, vector<16x128xf32>,
    return
  }
  func.func @transform_0(%arg0: i32) -> (i32, i32) {
    %c0_i32 = arith.constant 0 : i32
    %c0_i32_0 = arith.constant 0 : i32
    return %arg0, %c0_i32 : i32, i32
  }
  func.func @transform_1(%arg0: i32) -> (i32, i32) {
    %c0_i32 = arith.constant 0 : i32
    %c0_i32_0 = arith.constant 0 : i32
    return %arg0, %c0_i32 : i32, i32
  }
}

</mosaic_0001>

<bundles_post_ra>
// kernel: tpu_custom_call.1
= control target key start
LH: loop header
LB: loop body
LE: loop exit
PB: predicated region body
PF: predicated region fallthrough
CT: control target
= control target key end

     0   :  { %6 = vsyncpa [#allocation3], 0  ;;  %s162_s0 = inlined_call_operand.hbm [shape: f32[16,128], index: 0, kind: input, shape index: {}]   ;;  %s163_s1 = inlined_call_operand.hbm [shape: f32[16,128], index: 1, kind: output, shape index: {}]  }
   0x1   :  { %7 = vsyncpa [#allocation4], 0  ;;  %s118_s6 = smov [#allocation2]   ;;  %s70_s10 = scalar_lea.hbm %s162_s0, 256 }
   0x2   :  { %s13_s7 = sshll.u32 %s118_s6, 4  ;;  %p71_p0 = scmp.ne.s32.totalorder %s162_s0, %s70_s10  ;;  %s14_s7 = int_to_ptr.vmem [resolvable:$true] %s13_s7 }
   0x3   :  { %p74_p1 = scmp.lt.u32.totalorder %s70_s10, %s162_s0 }
   0x5   :  { %p76_p2 = pnand %p74_p1, %p71_p0 }
   0x7   :  { %79 = shalt.err (!%p76_p2)
}
   0x8   :  { %s80_s15 = scalar_lea.vmem %s14_s7, 256  ;;  %p85_p4 = scmp.lt.s32.totalorder %s14_s7, %s14_s7 }
   0x9   :  { %p81_p3 = scmp.ne.s32.totalorder %s14_s7, %s80_s15  ;;  %p86_p5 = scmp.lt.s32.totalorder %s80_s15, %s80_s15 }
   0xb   :  { %p87_p6 = por %p86_p5, %p85_p4 }
   0xd   :  { %p88_p7 = pnand %p87_p6, %p81_p3 }
   0xf   :  { %91 = shalt.err (!%p88_p7)
}
  0x10   :  { %s119_s16 = smov 128   ;;  %s120_s17 = smov 8  }
  0x11   :  { %19 = dma.hbm_to_vmem [thread:$0]  %s162_s0, 256, %s14_s7, [#allocation3], %s119_s16, %s119_s16, %s120_s17  }
  0x12   :  { %114 = dma.done.wait [#allocation3], 256  }
  0x13   :  { %115 = vsyncadd [#allocation3], 4294967040  ;;  %v23_v0 = vld [vmem:[#allocation2] sm:$0xff]  ;;  %v24_v1 = vld [vmem:[#allocation2 + $0x8] sm:$0xff]  ;;  %s121_s0 = smov [#allocation5]  }
  0x14   :  { %v25_v2 = vmul.f32 0.044715, %v23_v0  ;;  %v26_v3 = vmul.f32 0.044715, %v24_v1  ;;  %v35_v12 = vmul.f32 0.5, %v23_v0  ;;  %v36_v14 = vmul.f32 0.5, %v24_v1 }
  0x15   :  { %s50_s20 = sshll.u32 %s121_s0, 4  ;;  %s51_s20 = int_to_ptr.vmem [resolvable:$true] %s50_s20 }
  0x16   :  { %v27_v4 = vmul.f32 %v25_v2, %v23_v0  ;;  %v28_v5 = vmul.f32 %v26_v3, %v24_v1  ;;  %s92_s21 = scalar_lea.vmem %s51_s20, 256  ;;  %p97_p9 = scmp.lt.s32.totalorder %s51_s20, %s51_s20 }
  0x17   :  { %p93_p8 = scmp.ne.s32.totalorder %s51_s20, %s92_s21  ;;  %p98_p10 = scmp.lt.s32.totalorder %s92_s21, %s92_s21 }
  0x18   :  { %v29_v6 = vmul.f32 %v27_v4, %v23_v0  ;;  %v30_v7 = vmul.f32 %v28_v5, %v24_v1 }
  0x19   :  { %p99_p11 = por %p98_p10, %p97_p9 }
  0x1a   :  { %v31_v8 = vadd.f32 %v29_v6, %v23_v0  ;;  %v32_v9 = vadd.f32 %v30_v7, %v24_v1 }
  0x1b   :  { %p100_p12 = pnand %p99_p11, %p93_p8 }
  0x1c   :  { %v33_v10 = vmul.f32 0.7978846, %v31_v8  ;;  %v34_v11 = vmul.f32 0.7978846, %v32_v9 }
  0x1e   :  { %66 = vtanh.f32 %v33_v10 }
  0x1f   :  { %68 = vtanh.f32 %v34_v11 }
  0x28   :  { %v67_v13 = vpop.eup %66 }
  0x29   :  { %v69_v15 = vpop.eup %68  ;;  %v39_v16 = vadd.f32 1.0, %v67_v13 }
  0x2a   :  { %v40_v17 = vadd.f32 1.0, %v69_v15 }
  0x2b   :  { %v41_v18 = vmul.f32 %v39_v16, %v35_v12 }
  0x2c   :  { %v42_v19 = vmul.f32 %v40_v17, %v36_v14 }
  0x2d   :  { %43 = vst [vmem:[#allocation5] sm:$0xff] %v41_v18 }
  0x2e   :  { %44 = vst [vmem:[#allocation5 + $0x8] sm:$0xff] %v42_v19 }
  0x2f   :  { %103 = shalt.err (!%p100_p12)
}
  0x30   :  { %s104_s24 = scalar_lea.hbm %s163_s1, 256 }
  0x31   :  { %p105_p13 = scmp.ne.s32.totalorder %s163_s1, %s104_s24  ;;  %p108_p0 = scmp.lt.u32.totalorder %s104_s24, %s163_s1 }
  0x33   :  { %p110_p1 = pnand %p108_p0, %p105_p13 }
  0x35   :  { %113 = shalt.err (!%p110_p1)
}
  0x36   :  { %56 = dma.vmem_to_hbm [thread:$0]  %s51_s20, 256, %s163_s1, [#allocation4], %s119_s16, %s119_s16, %s120_s17  }
  0x37   :  { %116 = dma.done.wait [#allocation4], 256  }
  0x38   :  { %117 = vsyncadd [#allocation4], 4294967040 }
  0x39   :  { %60 = vsyncpa [#allocation3], 1 }
  0x3a   :  { %61 = vsyncpa [#allocation4], 1 }

</bundles_post_ra>
